<compile_context>
chip_gen: v6e
topology: v6e:2x2x1
jax: 0.10.0
libtpu: 0.0.40
codegen_flags: <defaults>
</compile_context>

<pallas_src>
import jax
import jax.numpy as jnp
from jax.experimental import pallas as pl
from jax.experimental.pallas import tpu as pltpu


def _conv1d_nc_kernel(x_ref, w_ref, b_ref, o_ref):
    """Direct Conv1d on a tile of TB batch rows; output already in NCW layout.

    x_ref : (TB, C_in, L_pad)   zero-padded input rows (streamed per step)
    w_ref : (K, C_out, C_in)    conv weight, tap-major (grid-invariant, resident)
    b_ref : (1, C_out, 1)       bias in f32 (grid-invariant, resident)
    o_ref : (TB, C_out, L_out)  output tile in final (B, C_out, L_out) layout
    """
    tb, c_out, l_out = o_ref.shape
    k_taps = w_ref.shape[0]
    c_in = w_ref.shape[2]

    acc = jnp.zeros((tb, c_out, l_out), jnp.float32)
    for k in range(k_taps):  # K is tiny and static -> unrolled
        # Shifted view of the padded input: tap k reads columns [k, k + L_out).
        x_k = x_ref[:, :, k:k + l_out]                              # (TB, C_in, L_out)
        # Broadcast the tap's (C_out, C_in) weight over the batch tile so the
        # contraction is a standard batched MXU matmul with output directly in
        # (b, C_out, L_out) order (no in-kernel transpose of the result).
        w_k = jnp.broadcast_to(w_ref[k][None], (tb, c_out, c_in))   # (TB, C_out, C_in)
        acc = acc + jnp.einsum(
            'boi,bit->bot', w_k, x_k, preferred_element_type=jnp.float32)
    acc = acc + b_ref[...].astype(jnp.float32)
    o_ref[...] = acc.astype(o_ref.dtype)


def cross_channel_conv(x, weight, bias, *, padding=1,
                       step_bytes_budget=4 * 1024 * 1024, max_tb=128):
    """Pallas forward of nn.Conv1d (stride 1, symmetric zero padding).

    x      : (B, C_in, L)
    weight : (C_out, C_in, K)
    bias   : (C_out,)
    returns: (B, C_out, L_out),  L_out = L + 2*padding - K + 1
    """
    B, C_in, L = x.shape
    C_out, C_in_w, K = weight.shape
    assert C_in == C_in_w
    L_pad = L + 2 * padding
    L_out = L_pad - K + 1
    assert L_out >= 1

    itemsize = jnp.dtype(x.dtype).itemsize

    # ---- batch-tile sizing: a few MiB of streamed bytes per grid step -------
    per_batch_bytes = (C_in * L_pad + C_out * L_out) * itemsize
    tb = int(max(1, min(max_tb, step_bytes_budget // max(per_batch_bytes, 1), B)))
    if B >= 2:
        # Keep at least 2 grid steps so v7x's two TensorCores both get work;
        # costs at most one extra ~0.35us step on single-TC chips.
        tb = min(tb, (B + 1) // 2)
    num_blocks = (B + tb - 1) // tb
    b_pad = num_blocks * tb

    # ---- glue (single pad pass; no im2col, no output relayout afterwards) ---
    x_padded = jnp.pad(x, ((0, b_pad - B), (0, 0), (padding, padding)))
    # Note: weights are cast to x.dtype to feed the MXU (not bit-identical to a
    # torch f32 conv when x is bf16); accumulation stays f32 regardless.
    w_t = weight.transpose(2, 0, 1).astype(x.dtype)        # (K, C_out, C_in)
    bias3 = bias.reshape(1, C_out, 1).astype(jnp.float32)  # (1, C_out, 1)

    out = pl.pallas_call(
        _conv1d_nc_kernel,
        out_shape=jax.ShapeDtypeStruct((b_pad, C_out, L_out), x.dtype),
        grid=(num_blocks,),
        in_specs=[
            # x: streamed batch tiles (last two dims equal the full array dims).
            pl.BlockSpec((tb, C_in, L_pad), lambda b: (b, 0, 0)),
            # weight / bias: constant index_map -> DMA'd once, resident in VMEM.
            pl.BlockSpec((K, C_out, C_in), lambda b: (0, 0, 0)),
            pl.BlockSpec((1, C_out, 1), lambda b: (0, 0, 0)),
        ],
        out_specs=pl.BlockSpec((tb, C_out, L_out), lambda b: (b, 0, 0)),
        compiler_params=pltpu.CompilerParams(
            dimension_semantics=("parallel",),
        ),
        cost_estimate=pl.CostEstimate(
            flops=2 * b_pad * C_out * C_in * K * L_out,
            transcendentals=0,
            bytes_accessed=(x_padded.size + w_t.size) * itemsize
            + bias3.size * 4
            + b_pad * C_out * L_out * itemsize,
        ),
    )(x_padded, w_t, bias3)

    if b_pad != B:
        out = out[:B]
    return out


if __name__ == "__main__":
    # Small shapes consistent with CrossChannelConv:
    #   in_channels=4, out_channels=8, kernel_size=3, padding=1
    #   x: (batch=2, in_channels=4, seq_len=16)
    B, C_in, L = 2, 4, 16
    C_out, K, padding = 8, 3, 1

    key = jax.random.PRNGKey(0)
    kx, kw, kb = jax.random.split(key, 3)

    x = jax.random.normal(kx, (B, C_in, L), dtype=jnp.float32)
    # Deterministic synthetic params (PyTorch-style uniform fan-in scaling).
    bound = 1.0 / (C_in * K) ** 0.5
    weight = jax.random.uniform(kw, (C_out, C_in, K), jnp.float32, -bound, bound)
    bias = jax.random.uniform(kb, (C_out,), jnp.float32, -bound, bound)

    out = cross_channel_conv(x, weight, bias, padding=padding)
    out = jax.block_until_ready(out)

    # Cross-check against XLA's conv (reference semantics of nn.Conv1d).
    ref = jax.lax.conv_general_dilated(
        x, weight,
        window_strides=(1,),
        padding=[(padding, padding)],
        dimension_numbers=("NCH", "OIH", "NCH"),
    ) + bias.reshape(1, C_out, 1)
    assert out.shape == (B, C_out, L + 2 * padding - K + 1)
    assert jnp.allclose(out, ref, atol=1e-5, rtol=1e-5)

    print("KERNEL_OK")
</pallas_src>

<mosaic_0001>
module attributes {stable_mosaic.version = 11 : i64} {
  func.func @_conv1d_nc_kernel(%arg0: i32, %arg1: memref<1x4x18xf32, #tpu.memory_space<vmem>>, %arg2: memref<3x8x4xf32, #tpu.memory_space<vmem>>, %arg3: memref<1x8x1xf32, #tpu.memory_space<vmem>>, %arg4: memref<1x8x16xf32, #tpu.memory_space<vmem>>) attributes {dimension_semantics = [#tpu.dimension_semantics<parallel>], iteration_bounds = array<i64: 2>, scalar_prefetch = 0 : i64, scratch_operands = 0 : i64, tpu.core_type = #tpu.core_type<tc>, window_params = [{transform_indices = @transform_0, window_bounds = array<i64: 1, 4, 18>}, {pipeline_mode = #tpu.pipeline_mode<synchronous>, transform_indices = @transform_1, window_bounds = array<i64: 3, 8, 4>}, {pipeline_mode = #tpu.pipeline_mode<synchronous>, transform_indices = @transform_2, window_bounds = array<i64: 1, 8, 1>}, {transform_indices = @transform_3, window_bounds = array<i64: 1, 8, 16>}]} {
    %cst = arith.constant 0.000000e+00 : f32
    %0 = vector.broadcast %cst : f32 to vector<1x8x16xf32>
    %c0 = arith.constant 0 : index
    %c0_0 = arith.constant 0 : index
    %c0_1 = arith.constant 0 : index
    %1 = vector.load %arg1[%c0, %c0_0, %c0_1] : memref<1x4x18xf32, #tpu.memory_space<vmem>>, vector<1x4x16xf32>
    %c0_2 = arith.constant 0 : index
    %c0_3 = arith.constant 0 : index
    %c0_4 = arith.constant 0 : index
    %2 = vector.load %arg2[%c0_2, %c0_3, %c0_4] : memref<3x8x4xf32, #tpu.memory_space<vmem>>, vector<1x8x4xf32>
    %3 = vector.shape_cast %2 : vector<1x8x4xf32> to vector<8x4xf32>
    %4 = vector.shape_cast %3 : vector<8x4xf32> to vector<1x8x4xf32>
    "tpu.trace_start"() <{level = 10 : i32, message = "boi,bit->bot"}> : () -> ()
    %cst_5 = arith.constant dense<0.000000e+00> : vector<1x8x16xf32>
    %5 = tpu.matmul %4, %1, %cst_5 {dimension_numbers = #tpu.dot_dimension_numbers<[2], [1], [1], [2], [0, 0, 0, 1, 1, 2], [0], [0]>} : vector<1x8x4xf32>, vector<1x4x16xf32>, vector<1x8x16xf32> -> vector<1x8x16xf32>
    "tpu.trace_stop"() : () -> ()
    %6 = arith.addf %0, %5 : vector<1x8x16xf32>
    %c0_6 = arith.constant 0 : index
    %c0_7 = arith.constant 0 : index
    %c1 = arith.constant 1 : index
    %7 = vector.load %arg1[%c0_6, %c0_7, %c1] : memref<1x4x18xf32, #tpu.memory_space<vmem>>, vector<1x4x16xf32>
    %c1_8 = arith.constant 1 : index
    %c0_9 = arith.constant 0 : index
    %c0_10 = arith.constant 0 : index
    %8 = vector.load %arg2[%c1_8, %c0_9, %c0_10] : memref<3x8x4xf32, #tpu.memory_space<vmem>>, vector<1x8x4xf32>
    %9 = vector.shape_cast %8 : vector<1x8x4xf32> to vector<8x4xf32>
    %10 = vector.shape_cast %9 : vector<8x4xf32> to vector<1x8x4xf32>
    "tpu.trace_start"() <{level = 10 : i32, message = "boi,bit->bot"}> : () -> ()
    %cst_11 = arith.constant dense<0.000000e+00> : vector<1x8x16xf32>
    %11 = tpu.matmul %10, %7, %cst_11 {dimension_numbers = #tpu.dot_dimension_numbers<[2], [1], [1], [2], [0, 0, 0, 1, 1, 2], [0], [0]>} : vector<1x8x4xf32>, vector<1x4x16xf32>, vector<1x8x16xf32> -> vector<1x8x16xf32>
    "tpu.trace_stop"() : () -> ()
    %12 = arith.addf %6, %11 : vector<1x8x16xf32>
    %c0_12 = arith.constant 0 : index
    %c0_13 = arith.constant 0 : index
    %c2 = arith.constant 2 : index
    %13 = vector.load %arg1[%c0_12, %c0_13, %c2] : memref<1x4x18xf32, #tpu.memory_space<vmem>>, vector<1x4x16xf32>
    %c2_14 = arith.constant 2 : index
    %c0_15 = arith.constant 0 : index
    %c0_16 = arith.constant 0 : index
    %14 = vector.load %arg2[%c2_14, %c0_15, %c0_16] : memref<3x8x4xf32, #tpu.memory_space<vmem>>, vector<1x8x4xf32>
    %15 = vector.shape_cast %14 : vector<1x8x4xf32> to vector<8x4xf32>
    %16 = vector.shape_cast %15 : vector<8x4xf32> to vector<1x8x4xf32>
    "tpu.trace_start"() <{level = 10 : i32, message = "boi,bit->bot"}> : () -> ()
    %cst_17 = arith.constant dense<0.000000e+00> : vector<1x8x16xf32>
    %17 = tpu.matmul %16, %13, %cst_17 {dimension_numbers = #tpu.dot_dimension_numbers<[2], [1], [1], [2], [0, 0, 0, 1, 1, 2], [0], [0]>} : vector<1x8x4xf32>, vector<1x4x16xf32>, vector<1x8x16xf32> -> vector<1x8x16xf32>
    "tpu.trace_stop"() : () -> ()
    %18 = arith.addf %12, %17 : vector<1x8x16xf32>
    %c0_18 = arith.constant 0 : index
    %c0_19 = arith.constant 0 : index
    %c0_20 = arith.constant 0 : index
    %19 = vector.load %arg3[%c0_18, %c0_19, %c0_20] : memref<1x8x1xf32, #tpu.memory_space<vmem>>, vector<1x8x1xf32>
    %20 = vector.broadcast %19 : vector<1x8x1xf32> to vector<1x8x16xf32>
    %21 = arith.addf %18, %20 : vector<1x8x16xf32>
    %c0_21 = arith.constant 0 : index
    %c0_22 = arith.constant 0 : index
    %c0_23 = arith.constant 0 : index
    %22 = vector.load %arg4[%c0_21, %c0_22, %c0_23] : memref<1x8x16xf32, #tpu.memory_space<vmem>>, vector<1x8x16xf32>
    tpu.vector_store %arg4[%c0_21, %c0_22, %c0_23], %21 {strides = array<i32>} : memref<1x8x16xf32, #tpu.memory_space<vmem>>, vector<1x8x16xf32>,
    return
  }
  func.func @transform_0(%arg0: i32) -> (i32, i32, i32) {
    %c0_i32 = arith.constant 0 : i32
    %c0_i32_0 = arith.constant 0 : i32
    %c0_i32_1 = arith.constant 0 : i32
    return %arg0, %c0_i32, %c0_i32_0 : i32, i32, i32
  }
  func.func @transform_1(%arg0: i32) -> (i32, i32, i32) {
    %c0_i32 = arith.constant 0 : i32
    %c0_i32_0 = arith.constant 0 : i32
    %c0_i32_1 = arith.constant 0 : i32
    %c0_i32_2 = arith.constant 0 : i32
    return %c0_i32, %c0_i32_0, %c0_i32_1 : i32, i32, i32
  }
  func.func @transform_2(%arg0: i32) -> (i32, i32, i32) {
    %c0_i32 = arith.constant 0 : i32
    %c0_i32_0 = arith.constant 0 : i32
    %c0_i32_1 = arith.constant 0 : i32
    %c0_i32_2 = arith.constant 0 : i32
    return %c0_i32, %c0_i32_0, %c0_i32_1 : i32, i32, i32
  }
  func.func @transform_3(%arg0: i32) -> (i32, i32, i32) {
    %c0_i32 = arith.constant 0 : i32
    %c0_i32_0 = arith.constant 0 : i32
    %c0_i32_1 = arith.constant 0 : i32
    return %arg0, %c0_i32, %c0_i32_0 : i32, i32, i32
  }
}

</mosaic_0001>

<bundles_post_ra>
// kernel: tpu_custom_call.1
= control target key start
LH: loop header
LB: loop body
LE: loop exit
PB: predicated region body
PF: predicated region fallthrough
CT: control target
= control target key end

     0   :  { %8 = vsyncpa [#allocation3], 0  ;;  %s772_s0 = inlined_call_operand.vmem [shape: f32[2,4,18], index: 0, kind: input, shape index: {}]   ;;  %s773_s1 = inlined_call_operand.vmem [shape: f32[3,8,4], index: 1, kind: input, shape index: {}]   ;;  %s774_s2 = inlined_call_operand.vmem [shape: f32[1,8,1], index: 2, kind: input, shape index: {}]   ;;  %s775_s3 = inlined_call_operand.hbm [shape: f32[2,8,16], index: 3, kind: output, shape index: {}]  }
   0x1   :  { %10 = vsyncpa [#allocation3 + $0x1], 0  ;;  %s664_s12 = smov 0   ;;  %s666_s13 = smov 0  }
   0x2   :  { %s668_s14 = smov 0   ;;  %s670_s15 = smov 0  }
   0x3 LB: > { %s685_s16 = sadd.s32 4294967295, %s636_s15   ;;  %s491_s17 = sadd.s32 4294967294, %s636_s15   ;;  %s636_s15 = sphi %s670_s15, %s781_s15   ;;  %s632_s14 = sphi %s668_s14, %s780_s14   ;;  %s628_s13 = sphi %s666_s13, %s779_s13   ;;  %s624_s12 = sphi %s664_s12, %s778_s12  }
   0x4   : > { %s689_s18 = sadd.s32 1, %s636_s15   ;;  %s91_s19 = sadd.s32 1, %s632_s14 }
   0x5   : > { %s88_s20 = ssub.s32 %s636_s15, %s689_s18  ;;  %p101_p0 = scmp.ne.s32.totalorder %s632_s14, %s628_s13 }
   0x6   : > { %p89_p1 = scmp.eq.s32.totalorder %s88_s20, 0  ;;  %p102_p2 = scmp.eq.s32.totalorder %s685_s16, 1 }
   0x7   : > { %p107_p3 = scmp.ne.s32.totalorder %s628_s13, %s624_s12  ;;  %p108_p4 = scmp.eq.s32.totalorder %s491_s17, 1 }
   0x8   : > { %s700_s21 = scalar_select %p89_p1, %s632_s14, %s91_s19  }
   0x9   : > { %p702_p5 = por %p102_p2, %p101_p0  ;;  %p706_p6 = por %p108_p4, %p107_p3 }
   0xa   : > { %p494_p7 = scmp.ge.s32.totalorder %s636_s15, 1  ;;  %p139_p8 = scmp.lt.s32.totalorder %s636_s15, 3 }
   0xc   : > { %p140_p9 = pnand %p494_p7, %p139_p8 }
   0xd   : > { %p162_p10 = scmp.lt.s32.totalorder (!%p140_p9), %s685_s16, 1  ;;  %s641_s6 = smov (!%p140_p9), 127  }
   0xe   : > { %143 = sbr.rel (%p140_p9) target bundleno = 354 (0x162), region = 32  ;;  %s642_s7 = smov (!%p140_p9), 126  }
   0xf   : > { %s159_s17 = sand.u32 (!%p140_p9), 1, %s628_s13   ;;  %s506_s20 = sshll.u32 (!%p140_p9), %s685_s16, 7 }
  0x10   : > { %s495_s19 = sshll.u32 (!%p140_p9), %s159_s17, 3  ;;  %s430_s28 = scalar_lea.hbm (!%p140_p9), %s775_s3, %s506_s20 }
  0x11   : > { %s161_s24 = scalar_lea.vmem (!%p140_p9), [#allocation2], %s495_s19  ;;  %s419_s29 = scalar_lea.sflag (!%p140_p9), [#allocation3], %s159_s17 }
  0x12   : > { %s432_s25 = sshll.u32 (!%p140_p9), %s161_s24, 4  ;;  %s643_s4 = smov (!%p140_p9), [#allocation2]   ;;  %s433_s25 = int_to_ptr.vmem [resolvable:$true] %s432_s25 }
  0x13   : > { %v638_v0 = vmov 0.0   ;;  %vm639_vm0 = vmmov 0   ;;  %v409_v1 = vld [vmem:[%s774_s2] sm:$0xff]  ;;  %s163_s26 = scalar_select %p162_p10, %s685_s16, 1  ;;  %v640_v2 = vmov 0   ;;  %vm178_vm1 = vcmask 1043456  }
  0x14   : > { %515 = vmatprep.subr.mxu0 %v638_v0  ;;  %517 = vmatprep.mubr.msk.f32.mxu0 %vm639_vm0, %v638_v0  ;;  %vm174_vm2 = vcmask 31744   ;;  %v167_v3 = vld [vmem:[%s773_s1] sm:$0xff]  ;;  %v497_v7 = vld [vmem:[%s773_s1 + $0x8] sm:$0xff]  ;;  %v502_v9 = vld [vmem:[%s773_s1 + $0x10] sm:$0xff]  ;;  %vm416_vm3 = vcmask 130048   ;;  %s580_s16 = sshll.u32 %s643_s4, 4  ;;  %s581_s16 = int_to_ptr.vmem [resolvable:$false] %s580_s16 }
  0x15   : > { %520 = vmatprep.subr.mxu1 %v638_v0  ;;  %522 = vmatprep.mubr.msk.f32.mxu1 %vm639_vm0, %v638_v0  ;;  %s496_s27 = sshll.u32 %s163_s26, 2  ;;  %s582_s5 = scalar_lea.vmem %s581_s16, 256 }
  0x16   : > { %574 = vset.pattern.permute.xlu1 %v640_v2  ;;  %575 = vset.pattern.permute.xlu0 %v640_v2  ;;  %s165_s30 = scalar_lea.vmem %s772_s0, %s496_s27  ;;  %p583_p0 = scmp.lt.s32.totalorder %s433_s25, %s581_s16 }
  0x17   : > { %412 = vperm.xlu1 %574, %v409_v1   ;;  %v168_v4 = vld [vmem:[%s165_s30] sm:$0xf] }
  0x18   : > { %v166_v5 = vld [vmem:[%s165_s30] sm:$0xf]  ;;  %172 = vrot.lane.b32.xlu0 %v168_v4, %s641_s6 }
  0x19   : > { %521 = vmatpush3.msk.msra.mxu1 %vm178_vm1, %v166_v5  ;;  %v327_v6 = vld [vmem:[%s165_s30] sm:$0xf]  ;;  %s576_s30 = scalar_lea.vmem %s433_s25, 128 }
  0x1a   : > { %523 = vmatmul.mubr.msk.f32.vlgmr.msra.gmra.mxu1 %vm174_vm2, %v167_v3  ;;  %p577_p11 = scmp.ne.s32.totalorder %s433_s25, %s576_s30  ;;  %p584_p1 = scmp.lt.s32.totalorder %s582_s5, %s576_s30 }
  0x1c   : > { %331 = vrot.lane.b32.xlu0 %v327_v6, %s642_s7  ;;  %p578_p12 = pnand %p577_p11, %p702_p5  ;;  %p585_p2 = por %p584_p1, %p583_p0 }
  0x1e   : > { %p579_p13 = pneg %p578_p12 }
  0x20   : > { %p586_p3 = pnand %p585_p2, %p579_p13 }
  0x8a   : > { %v173_v8 = vpop.permute.xlu0 %172 }
  0x8b   : > { %516 = vmatpush3.msk.msra.mxu0 %vm178_vm1, %v173_v8 }
  0x8c   : > { %518 = vmatmul.mubr.msk.f32.vlgmr.msra.gmra.mxu0 %vm174_vm2, %v497_v7  ;;  %525 = vmatprep.subr.mxu0 %v638_v0 }
  0x8d   : > { %527 = vmatprep.mubr.msk.f32.mxu0 %vm639_vm0, %v638_v0 }
  0x8e   : > { %v332_v10 = vpop.permute.xlu0 %331 }
  0x8f   : > { %526 = vmatpush3.msk.msra.mxu0 %vm178_vm1, %v332_v10 }
  0x90   : > { %528 = vmatmul.mubr.msk.f32.vlgmr.msra.gmra.mxu0 %vm174_vm2, %v502_v9 }
  0x92   : > { %v413_v17 = vpop.permute.xlu1 %412 }
  0xda   : > { %v323_v11 = vpop.f32.mrf.mxu1 }
  0xdc   : > { %v524_v12 = vpop.f32.mrf.mxu1 }
 0x14c   : > { %v247_v13 = vpop.f32.mrf.mxu0 }
 0x14d   : > { %v324_v15 = vadd.f32 %v323_v11, %v247_v13 }
 0x14e   : > { %v519_v14 = vpop.f32.mrf.mxu0 }
 0x150   : > { %v404_v16 = vpop.f32.mrf.mxu0 }
 0x151   : > { %v408_v18 = vadd.f32 %v404_v16, %v324_v15 }
 0x152   : > { %v529_v19 = vpop.f32.mrf.mxu0 }
 0x153   : > { %v415_v20 = vadd.f32 %v413_v17, %v408_v18 }
 0x155   : > { %417 = vst.msk [vmem:[%s161_s24] sm:$0xff] %vm416_vm3, %v415_v20 }
 0x156   : > { %589 = shalt.err (!%p586_p3)
}
 0x157   : > { %s590_s6 = scalar_lea.hbm %s430_s28, 128  ;;  %s594_s9 = scalar_lea.hbm %s775_s3, 256 }
 0x158   : > { %p591_p4 = scmp.ne.s32.totalorder %s430_s28, %s590_s6  ;;  %p595_p9 = scmp.lt.s32.totalorder %s430_s28, %s775_s3 }
 0x159   : > { %p596_p10 = scmp.lt.s32.totalorder %s594_s9, %s590_s6 }
 0x15a   : > { %p592_p7 = pnand %p591_p4, %p702_p5 }
 0x15b   : > { %p597_p11 = por %p596_p10, %p595_p9 }
 0x15c   : > { %p593_p8 = pneg %p592_p7 }
 0x15e   : > { %p598_p12 = pnand %p597_p11, %p593_p8 }
 0x160   : > { %601 = shalt.err (!%p598_p12)
}
 0x161   : > { %530 = dma.vmem_to_hbm [thread:$0]  (%p702_p5), %s433_s25, 128, %s430_s28, %s419_s29  }
 0x162 PF: > { %p536_p13 = scmp.ge.s32.totalorder %s636_s15, 2  ;;  %s444_s17 = sand.u32 1, %s624_s12  }
 0x163   : > { %s445_s19 = scalar_lea.sflag [#allocation3], %s444_s17 }
 0x164   : > { %p533_p0 = pnand %p536_p13, %p706_p6 }
 0x166   : > { %p534_p1 = pneg %p533_p0 }
 0x168   : > { %619 = dma.done.wait (%p534_p1), %s445_s19, 128  }
 0x169   : > { %621 = vsyncadd (%p534_p1), %s445_s19, 4294967168  ;;  %p13_p2 = scmp.ge.s32.totalorder %s689_s18, 4   ;;  %s778_s12 = smov %s628_s13 }
 0x16a   : > { %s779_s13 = smov %s632_s14  ;;  %s780_s14 = smov %s700_s21 }
 0x16b   : > { %s781_s15 = smov %s689_s18  ;;  %15 = sbr.rel (!%p13_p2) target bundleno = 3 (0x3), region = 69 }
 0x170   :  { %450 = vsyncpa [#allocation3], 1 }
 0x171   :  { %452 = vsyncpa [#allocation3 + $0x1], 1 }

</bundles_post_ra>
